<compile_context>
chip_gen: v7x
topology: tpu7x:2x2x1
jax: 0.10.0
libtpu: 0.0.40
codegen_flags: <defaults>
</compile_context>

<pallas_src>
import math
from functools import partial

import jax
import jax.numpy as jnp
from jax import lax
from jax.experimental import pallas as pl
from jax.experimental.pallas import tpu as pltpu


_VMEM_LIMIT = 64 * 1024 * 1024   # <= v7x physical (64 MiB), raises v5e/v6e scoped default
_NEG_INF = -1e30                 # finite mask value: no exp(-inf - -inf) NaNs in blocked softmax


def _pick_tile(n, target):
    """Largest nice tile <= target that divides n; falls back to the full dim."""
    for c in (target, 512, 256, 128, 64, 32, 16, 8):
        if c <= n and n % c == 0:
            return c
    return n


def _compiler_params(semantics):
    return pltpu.CompilerParams(dimension_semantics=semantics,
                                vmem_limit_bytes=_VMEM_LIMIT)


def _rmsnorm_f32(x):
    x = x.astype(jnp.float32)
    ms = jnp.mean(x * x, axis=-1, keepdims=True)
    return x * lax.rsqrt(ms + 1e-6)


def _rotate_half(x, n_head, hd):
    """Per-head [x2, x1] on a full-width (rows, C) tile (static slices)."""
    d = hd // 2
    parts = []
    for h in range(n_head):
        base = h * hd
        parts.append(x[:, base + d: base + hd])
        parts.append(x[:, base: base + d])
    return jnp.concatenate(parts, axis=-1)


# --------------------------- fused QKV projection ---------------------------
# rmsnorm(x) @ {Wq, Wk, Wv} with rotary applied to q, k in the epilogue.

def _qkv_kernel(x_ref, wq_ref, wk_ref, wv_ref, cos_ref, sin_ref,
                q_ref, k_ref, v_ref, *, n_head, hd):
    xn = _rmsnorm_f32(x_ref[...]).astype(jnp.bfloat16)
    cos = cos_ref[...]
    sin = sin_ref[...]
    q = jnp.dot(xn, wq_ref[...], preferred_element_type=jnp.float32)
    k = jnp.dot(xn, wk_ref[...], preferred_element_type=jnp.float32)
    v = jnp.dot(xn, wv_ref[...], preferred_element_type=jnp.float32)
    # RoPE on full-width tiles, applied exactly once per element.
    q = q * cos + _rotate_half(q, n_head, hd) * sin
    k = k * cos + _rotate_half(k, n_head, hd) * sin
    q_ref[...] = q.astype(q_ref.dtype)
    k_ref[...] = k.astype(k_ref.dtype)
    v_ref[...] = v.astype(v_ref.dtype)


def qkv_project(x2d, wq, wk, wv, cos_t, sin_t, T, n_head):
    M, C = x2d.shape
    hd = C // n_head
    tm = _pick_tile(T, 256)          # divides T => tiles never straddle a sequence
    nt = T // tm
    row_f32 = pl.BlockSpec((tm, C), lambda i: (i, 0))
    w_spec = pl.BlockSpec((C, C), lambda i: (0, 0))
    tbl_spec = pl.BlockSpec((tm, C), lambda i: (i % nt, 0))
    out_spec = pl.BlockSpec((tm, C), lambda i: (i, 0))
    return pl.pallas_call(
        partial(_qkv_kernel, n_head=n_head, hd=hd),
        out_shape=tuple(jax.ShapeDtypeStruct((M, C), jnp.bfloat16) for _ in range(3)),
        grid=(M // tm,),
        in_specs=[row_f32, w_spec, w_spec, w_spec, tbl_spec, tbl_spec],
        out_specs=(out_spec, out_spec, out_spec),
        compiler_params=_compiler_params(("parallel",)),
    )(x2d, wq, wk, wv, cos_t, sin_t)


# ----------------------- blocked causal flash attention ----------------------

def _flash_attn_kernel(q_ref, k_ref, v_ref, o_ref, acc_ref, m_ref, l_ref,
                       *, n_head, hd, tq, tkv, scale):
    qi = pl.program_id(1)
    ki = pl.program_id(2)
    nk = pl.num_programs(2)

    @pl.when(ki == 0)
    def _init():
        acc_ref[...] = jnp.zeros_like(acc_ref)
        m_ref[...] = jnp.full_like(m_ref, _NEG_INF)
        l_ref[...] = jnp.zeros_like(l_ref)

    # Skip kv blocks entirely above the causal diagonal (~2x less MXU/EUP work).
    @pl.when(ki * tkv < (qi + 1) * tq)
    def _compute():
        q = q_ref[0]                                 # (tq, C) bf16, rotary applied
        k = k_ref[0]                                 # (tkv, C) bf16
        v = v_ref[0]                                 # (tkv, C) bf16
        row = qi * tq + lax.broadcasted_iota(jnp.int32, (tq, tkv), 0)
        col = ki * tkv + lax.broadcasted_iota(jnp.int32, (tq, tkv), 1)
        causal = col <= row
        for h in range(n_head):                      # heads = static column windows
            sl = slice(h * hd, (h + 1) * hd)
            s = lax.dot_general(q[:, sl], k[:, sl],
                                (((1,), (1,)), ((), ())),
                                preferred_element_type=jnp.float32) * scale
            s = jnp.where(causal, s, _NEG_INF)
            m_prev = m_ref[:, h:h + 1]
            m_new = jnp.maximum(m_prev, jnp.max(s, axis=-1, keepdims=True))
            alpha = jnp.exp(m_prev - m_new)
            p = jnp.exp(s - m_new)
            l_ref[:, h:h + 1] = alpha * l_ref[:, h:h + 1] + jnp.sum(p, axis=-1, keepdims=True)
            acc_ref[:, sl] = alpha * acc_ref[:, sl] + jnp.dot(
                p.astype(jnp.bfloat16), v[:, sl], preferred_element_type=jnp.float32)
            m_ref[:, h:h + 1] = m_new

    @pl.when(ki == nk - 1)
    def _finalize():
        for h in range(n_head):
            sl = slice(h * hd, (h + 1) * hd)
            inv = pl.reciprocal(l_ref[:, h:h + 1], approx=True)
            o_ref[0, :, sl] = (acc_ref[:, sl] * inv).astype(o_ref.dtype)


def flash_attention(q, k, v, n_head):
    B, T, C = q.shape
    hd = C // n_head
    tq = _pick_tile(T, 256)
    tkv = tq                               # equal tiles => every row in a computed
    nq, nk = T // tq, T // tkv             # block has >= 1 unmasked column
    scale = 1.0 / math.sqrt(hd)

    q_spec = pl.BlockSpec((1, tq, C), lambda b, i, j: (b, i, 0))
    # clamp the kv block index for skipped (fully masked) blocks -> DMA is elided
    kv_spec = pl.BlockSpec((1, tkv, C), lambda b, i, j: (b, jnp.minimum(j, i), 0))
    out_spec = pl.BlockSpec((1, tq, C), lambda b, i, j: (b, i, 0))

    return pl.pallas_call(
        partial(_flash_attn_kernel, n_head=n_head, hd=hd, tq=tq, tkv=tkv, scale=scale),
        out_shape=jax.ShapeDtypeStruct((B, T, C), jnp.bfloat16),
        grid=(B, nq, nk),
        in_specs=[q_spec, kv_spec, kv_spec],
        out_specs=out_spec,
        scratch_shapes=[pltpu.VMEM((tq, C), jnp.float32),       # acc (all heads)
                        pltpu.VMEM((tq, n_head), jnp.float32),  # running max
                        pltpu.VMEM((tq, n_head), jnp.float32)], # running sum
        compiler_params=_compiler_params(("parallel", "parallel", "arbitrary")),
    )(q, k, v)


# -------------------- attention output proj + scaled residual ----------------

def _proj_residual_kernel(y_ref, w_ref, res_ref, o_ref, *, scale):
    yw = jnp.dot(y_ref[...], w_ref[...], preferred_element_type=jnp.float32)
    o_ref[...] = res_ref[...] + scale * yw


def attn_out_project(y2d, wo, residual, scale):
    M, C = y2d.shape
    tm = _pick_tile(M, 256)
    return pl.pallas_call(
        partial(_proj_residual_kernel, scale=scale),
        out_shape=jax.ShapeDtypeStruct((M, C), jnp.float32),
        grid=(M // tm,),
        in_specs=[pl.BlockSpec((tm, C), lambda i: (i, 0)),
                  pl.BlockSpec((C, C), lambda i: (0, 0)),
                  pl.BlockSpec((tm, C), lambda i: (i, 0))],
        out_specs=pl.BlockSpec((tm, C), lambda i: (i, 0)),
        compiler_params=_compiler_params(("parallel",)),
    )(y2d, wo, residual)


# ------------------- fused MLP: x + W2 @ gelu(W1 @ rmsnorm(x)) ----------------

def _mlp_kernel(x_ref, w1_ref, w2_ref, o_ref):
    x = x_ref[...]                                       # (tm, C) f32 residual
    xn = _rmsnorm_f32(x).astype(jnp.bfloat16)
    h = jnp.dot(xn, w1_ref[...], preferred_element_type=jnp.float32)
    h = 0.5 * h * (1.0 + lax.erf(h * (2.0 ** -0.5)))     # exact GELU (F.gelu default)
    y = jnp.dot(h.astype(jnp.bfloat16), w2_ref[...], preferred_element_type=jnp.float32)
    o_ref[...] = x + y


def mlp_block(x2d, w1, w2):
    M, C = x2d.shape
    H = w1.shape[1]
    tm = _pick_tile(M, 256)        # keeps the (tm, 4C) intermediate VMEM-only
    return pl.pallas_call(
        _mlp_kernel,
        out_shape=jax.ShapeDtypeStruct((M, C), jnp.float32),
        grid=(M // tm,),
        in_specs=[pl.BlockSpec((tm, C), lambda i: (i, 0)),
                  pl.BlockSpec((C, H), lambda i: (0, 0)),
                  pl.BlockSpec((H, C), lambda i: (0, 0))],
        out_specs=pl.BlockSpec((tm, C), lambda i: (i, 0)),
        compiler_params=_compiler_params(("parallel",)),
    )(x2d, w1, w2)


# --------------- final rmsnorm + tied lm_head (no wte transpose) --------------

def _lm_head_kernel(x_ref, wte_ref, o_ref):
    xn = _rmsnorm_f32(x_ref[...]).astype(jnp.bfloat16)
    o_ref[...] = lax.dot_general(xn, wte_ref[...],
                                 (((1,), (1,)), ((), ())),
                                 preferred_element_type=jnp.float32)


def lm_head_logits(x2d, wte):
    M, C = x2d.shape
    V = wte.shape[0]
    tm = _pick_tile(M, 256)
    tv = _pick_tile(V, 2048)
    # TODO(synk): for real vocab sizes (e.g. 50257) pad V up to a multiple of 128
    # so the vocab axis tiles; otherwise tv falls back to the full vocab dim.
    return pl.pallas_call(
        _lm_head_kernel,
        out_shape=jax.ShapeDtypeStruct((M, V), jnp.float32),
        grid=(M // tm, V // tv),
        in_specs=[pl.BlockSpec((tm, C), lambda i, j: (i, 0)),
                  pl.BlockSpec((tv, C), lambda i, j: (j, 0))],
        out_specs=pl.BlockSpec((tm, tv), lambda i, j: (i, j)),
        compiler_params=_compiler_params(("parallel", "parallel")),
    )(x2d, wte)


# ------------------------------- GPT forward ---------------------------------

def init_params(key, vocab_size, n_layer, n_head, n_embd):
    C = n_embd
    keys = jax.random.split(key, 1 + 6 * n_layer)

    def w(k, shape):
        return (0.02 * jax.random.normal(k, shape, jnp.float32)).astype(jnp.bfloat16)

    params = {"n_head": n_head, "wte": w(keys[0], (vocab_size, C)), "blocks": []}
    for l in range(n_layer):
        k = keys[1 + 6 * l: 1 + 6 * (l + 1)]
        params["blocks"].append({
            "wq": w(k[0], (C, C)), "wk": w(k[1], (C, C)), "wv": w(k[2], (C, C)),
            "wo": w(k[3], (C, C)),
            "w1": w(k[4], (C, 4 * C)), "w2": w(k[5], (4 * C, C)),
        })
    return params


def gpt_forward(params, idx, targets=None, return_logits=True):
    B, T = idx.shape
    wte = params["wte"]                       # (V, C) bf16, tied with lm_head
    n_head = params["n_head"]
    C = wte.shape[1]
    hd = C // n_head
    n_layer = len(params["blocks"])
    attn_scale = 1.0 / math.sqrt(2 * n_layer)

    # rotary tables at full head width: per-head pattern [cos, cos] / [sin, -sin],
    # tiled across heads -> (T, C) f32, consumed by the QKV-projection epilogue.
    inv_freq = 1.0 / (10000.0 ** (jnp.arange(0, hd, 2, dtype=jnp.float32) / hd))
    freqs = jnp.outer(jnp.arange(T, dtype=jnp.float32), inv_freq)   # (T, hd//2)
    cos_h = jnp.concatenate([jnp.cos(freqs), jnp.cos(freqs)], axis=-1)
    sin_h = jnp.concatenate([jnp.sin(freqs), -jnp.sin(freqs)], axis=-1)
    cos_t = jnp.tile(cos_h, (1, n_head))      # (T, C)
    sin_t = jnp.tile(sin_h, (1, n_head))

    # embedding gather (glue); residual stream kept in f32
    x2d = jnp.take(wte, idx, axis=0).astype(jnp.float32).reshape(B * T, C)

    for blk in params["blocks"]:
        # attention sub-block: rmsnorm + QKV + rotary fused; flash attention;
        # output projection fused with the scaled residual add.
        q, k, v = qkv_project(x2d, blk["wq"], blk["wk"], blk["wv"],
                              cos_t, sin_t, T, n_head)
        y = flash_attention(q.reshape(B, T, C), k.reshape(B, T, C),
                            v.reshape(B, T, C), n_head)
        x2d = attn_out_project(y.reshape(B * T, C), blk["wo"], x2d, attn_scale)
        # MLP sub-block: rmsnorm + W1 + gelu + W2 + residual, fused.
        x2d = mlp_block(x2d, blk["w1"], blk["w2"])

    if targets is not None:
        logits = lm_head_logits(x2d, wte).reshape(B, T, -1)     # final rmsnorm fused
        logits = logits.astype(jnp.float32)
        # cross_entropy with ignore_index=-1 (glue reduction)
        logp = jax.nn.log_softmax(logits.reshape(B * T, -1), axis=-1)
        tgt = targets.reshape(-1)
        valid = tgt != -1
        safe = jnp.where(valid, tgt, 0)
        nll = -jnp.take_along_axis(logp, safe[:, None], axis=1)[:, 0]
        loss = jnp.sum(jnp.where(valid, nll, 0.0)) / jnp.maximum(jnp.sum(valid), 1)
    else:
        x_last = x2d.reshape(B, T, C)[:, -1, :]                 # (B, C)
        logits = lm_head_logits(x_last, wte).reshape(B, 1, -1).astype(jnp.float32)
        loss = None

    if not return_logits:
        logits = None
    return logits, loss


# ----------------------------------- main ------------------------------------

if __name__ == "__main__":
    vocab_size, n_layer, n_head, n_embd = 128, 2, 4, 64
    B, T = 2, 16

    key = jax.random.PRNGKey(0)
    kp, ki, kt = jax.random.split(key, 3)
    params = init_params(kp, vocab_size, n_layer, n_head, n_embd)
    idx = jax.random.randint(ki, (B, T), 0, vocab_size, dtype=jnp.int32)
    targets = jax.random.randint(kt, (B, T), 0, vocab_size, dtype=jnp.int32)

    # training-style call (full-sequence logits + loss)
    logits_tr, loss = gpt_forward(params, idx, targets)
    jax.block_until_ready(logits_tr)
    jax.block_until_ready(loss)
    assert logits_tr.shape == (B, T, vocab_size)
    assert bool(jnp.isfinite(loss))

    # inference-style call (last-token logits, no loss)
    logits_inf, loss_none = gpt_forward(params, idx, None)
    jax.block_until_ready(logits_inf)
    assert logits_inf.shape == (B, 1, vocab_size)
    assert loss_none is None

    print("KERNEL_OK")
</pallas_src>

<mosaic_0001>
module attributes {stable_mosaic.version = 11 : i64} {
  func.func @_qkv_kernel(%arg0: i32, %arg1: memref<16x64xf32, #tpu.memory_space<vmem>>, %arg2: memref<64x64xbf16, #tpu.memory_space<vmem>>, %arg3: memref<64x64xbf16, #tpu.memory_space<vmem>>, %arg4: memref<64x64xbf16, #tpu.memory_space<vmem>>, %arg5: memref<16x64xf32, #tpu.memory_space<vmem>>, %arg6: memref<16x64xf32, #tpu.memory_space<vmem>>, %arg7: memref<16x64xbf16, #tpu.memory_space<vmem>>, %arg8: memref<16x64xbf16, #tpu.memory_space<vmem>>, %arg9: memref<16x64xbf16, #tpu.memory_space<vmem>>) attributes {dimension_semantics = [#tpu.dimension_semantics<parallel>], iteration_bounds = array<i64: 2>, scalar_prefetch = 0 : i64, scratch_operands = 0 : i64, tpu.core_type = #tpu.core_type<tc>, window_params = [{transform_indices = @transform_0, window_bounds = array<i64: 16, 64>}, {pipeline_mode = #tpu.pipeline_mode<synchronous>, transform_indices = @transform_1, window_bounds = array<i64: 64, 64>}, {pipeline_mode = #tpu.pipeline_mode<synchronous>, transform_indices = @transform_2, window_bounds = array<i64: 64, 64>}, {pipeline_mode = #tpu.pipeline_mode<synchronous>, transform_indices = @transform_3, window_bounds = array<i64: 64, 64>}, {transform_indices = @transform_4, window_bounds = array<i64: 16, 64>}, {transform_indices = @transform_5, window_bounds = array<i64: 16, 64>}, {transform_indices = @transform_6, window_bounds = array<i64: 16, 64>}, {transform_indices = @transform_7, window_bounds = array<i64: 16, 64>}, {transform_indices = @transform_8, window_bounds = array<i64: 16, 64>}]} {
    %c0 = arith.constant 0 : index
    %c0_0 = arith.constant 0 : index
    %0 = vector.load %arg1[%c0, %c0_0] : memref<16x64xf32, #tpu.memory_space<vmem>>, vector<16x64xf32>
    %1 = arith.mulf %0, %0 : vector<16x64xf32>
    %cst = arith.constant dense<0.000000e+00> : vector<16xf32>
    %2 = vector.multi_reduction <add>, %1, %cst [1] : vector<16x64xf32> to vector<16xf32>
    %3 = vector.shape_cast %2 : vector<16xf32> to vector<16x1xf32>
    %cst_1 = arith.constant 6.400000e+01 : f32
    %4 = vector.broadcast %cst_1 : f32 to vector<16x1xf32>
    %5 = arith.divf %3, %4 : vector<16x1xf32>
    %cst_2 = arith.constant 9.99999997E-7 : f32
    %6 = vector.broadcast %cst_2 : f32 to vector<16x1xf32>
    %7 = arith.addf %5, %6 : vector<16x1xf32>
    %8 = math.rsqrt %7 : vector<16x1xf32>
    %9 = vector.broadcast %8 : vector<16x1xf32> to vector<16x64xf32>
    %10 = arith.mulf %0, %9 : vector<16x64xf32>
    %11 = arith.truncf %10 : vector<16x64xf32> to vector<16x64xbf16>
    %c0_3 = arith.constant 0 : index
    %c0_4 = arith.constant 0 : index
    %12 = vector.load %arg5[%c0_3, %c0_4] : memref<16x64xf32, #tpu.memory_space<vmem>>, vector<16x64xf32>
    %c0_5 = arith.constant 0 : index
    %c0_6 = arith.constant 0 : index
    %13 = vector.load %arg6[%c0_5, %c0_6] : memref<16x64xf32, #tpu.memory_space<vmem>>, vector<16x64xf32>
    %c0_7 = arith.constant 0 : index
    %c0_8 = arith.constant 0 : index
    %14 = vector.load %arg2[%c0_7, %c0_8] : memref<64x64xbf16, #tpu.memory_space<vmem>>, vector<64x64xbf16>
    %cst_9 = arith.constant dense<0.000000e+00> : vector<16x64xf32>
    %15 = tpu.matmul %11, %14, %cst_9 {dimension_numbers = #tpu.dot_dimension_numbers<[1], [0], [0], [1], [0, 0, 1, 1], [], []>} : vector<16x64xbf16>, vector<64x64xbf16>, vector<16x64xf32> -> vector<16x64xf32>
    %c0_10 = arith.constant 0 : index
    %c0_11 = arith.constant 0 : index
    %16 = vector.load %arg3[%c0_10, %c0_11] : memref<64x64xbf16, #tpu.memory_space<vmem>>, vector<64x64xbf16>
    %cst_12 = arith.constant dense<0.000000e+00> : vector<16x64xf32>
    %17 = tpu.matmul %11, %16, %cst_12 {dimension_numbers = #tpu.dot_dimension_numbers<[1], [0], [0], [1], [0, 0, 1, 1], [], []>} : vector<16x64xbf16>, vector<64x64xbf16>, vector<16x64xf32> -> vector<16x64xf32>
    %c0_13 = arith.constant 0 : index
    %c0_14 = arith.constant 0 : index
    %18 = vector.load %arg4[%c0_13, %c0_14] : memref<64x64xbf16, #tpu.memory_space<vmem>>, vector<64x64xbf16>
    %cst_15 = arith.constant dense<0.000000e+00> : vector<16x64xf32>
    %19 = tpu.matmul %11, %18, %cst_15 {dimension_numbers = #tpu.dot_dimension_numbers<[1], [0], [0], [1], [0, 0, 1, 1], [], []>} : vector<16x64xbf16>, vector<64x64xbf16>, vector<16x64xf32> -> vector<16x64xf32>
    %20 = arith.mulf %15, %12 : vector<16x64xf32>
    %21 = vector.extract_strided_slice %15 {offsets = [0, 8], sizes = [16, 8], strides = [1, 1]} : vector<16x64xf32> to vector<16x8xf32>
    %22 = vector.extract_strided_slice %15 {offsets = [0, 0], sizes = [16, 8], strides = [1, 1]} : vector<16x64xf32> to vector<16x8xf32>
    %23 = vector.extract_strided_slice %15 {offsets = [0, 24], sizes = [16, 8], strides = [1, 1]} : vector<16x64xf32> to vector<16x8xf32>
    %24 = vector.extract_strided_slice %15 {offsets = [0, 16], sizes = [16, 8], strides = [1, 1]} : vector<16x64xf32> to vector<16x8xf32>
    %25 = vector.extract_strided_slice %15 {offsets = [0, 40], sizes = [16, 8], strides = [1, 1]} : vector<16x64xf32> to vector<16x8xf32>
    %26 = vector.extract_strided_slice %15 {offsets = [0, 32], sizes = [16, 8], strides = [1, 1]} : vector<16x64xf32> to vector<16x8xf32>
    %27 = vector.extract_strided_slice %15 {offsets = [0, 56], sizes = [16, 8], strides = [1, 1]} : vector<16x64xf32> to vector<16x8xf32>
    %28 = vector.extract_strided_slice %15 {offsets = [0, 48], sizes = [16, 8], strides = [1, 1]} : vector<16x64xf32> to vector<16x8xf32>
    %29 = tpu.concatenate %21, %22, %23, %24, %25, %26, %27, %28 in 1 : vector<16x8xf32>, vector<16x8xf32>, vector<16x8xf32>, vector<16x8xf32>, vector<16x8xf32>, vector<16x8xf32>, vector<16x8xf32>, vector<16x8xf32> -> vector<16x64xf32>
    %30 = arith.mulf %29, %13 : vector<16x64xf32>
    %31 = arith.addf %20, %30 : vector<16x64xf32>
    %32 = arith.mulf %17, %12 : vector<16x64xf32>
    %33 = vector.extract_strided_slice %17 {offsets = [0, 8], sizes = [16, 8], strides = [1, 1]} : vector<16x64xf32> to vector<16x8xf32>
    %34 = vector.extract_strided_slice %17 {offsets = [0, 0], sizes = [16, 8], strides = [1, 1]} : vector<16x64xf32> to vector<16x8xf32>
    %35 = vector.extract_strided_slice %17 {offsets = [0, 24], sizes = [16, 8], strides = [1, 1]} : vector<16x64xf32> to vector<16x8xf32>
    %36 = vector.extract_strided_slice %17 {offsets = [0, 16], sizes = [16, 8], strides = [1, 1]} : vector<16x64xf32> to vector<16x8xf32>
    %37 = vector.extract_strided_slice %17 {offsets = [0, 40], sizes = [16, 8], strides = [1, 1]} : vector<16x64xf32> to vector<16x8xf32>
    %38 = vector.extract_strided_slice %17 {offsets = [0, 32], sizes = [16, 8], strides = [1, 1]} : vector<16x64xf32> to vector<16x8xf32>
    %39 = vector.extract_strided_slice %17 {offsets = [0, 56], sizes = [16, 8], strides = [1, 1]} : vector<16x64xf32> to vector<16x8xf32>
    %40 = vector.extract_strided_slice %17 {offsets = [0, 48], sizes = [16, 8], strides = [1, 1]} : vector<16x64xf32> to vector<16x8xf32>
    %41 = tpu.concatenate %33, %34, %35, %36, %37, %38, %39, %40 in 1 : vector<16x8xf32>, vector<16x8xf32>, vector<16x8xf32>, vector<16x8xf32>, vector<16x8xf32>, vector<16x8xf32>, vector<16x8xf32>, vector<16x8xf32> -> vector<16x64xf32>
    %42 = arith.mulf %41, %13 : vector<16x64xf32>
    %43 = arith.addf %32, %42 : vector<16x64xf32>
    %44 = arith.truncf %31 : vector<16x64xf32> to vector<16x64xbf16>
    %c0_16 = arith.constant 0 : index
    %c0_17 = arith.constant 0 : index
    %45 = vector.load %arg7[%c0_16, %c0_17] : memref<16x64xbf16, #tpu.memory_space<vmem>>, vector<16x64xbf16>
    tpu.vector_store %arg7[%c0_16, %c0_17], %44 {strides = array<i32>} : memref<16x64xbf16, #tpu.memory_space<vmem>>, vector<16x64xbf16>,
    %46 = arith.truncf %43 : vector<16x64xf32> to vector<16x64xbf16>
    %c0_18 = arith.constant 0 : index
    %c0_19 = arith.constant 0 : index
    %47 = vector.load %arg8[%c0_18, %c0_19] : memref<16x64xbf16, #tpu.memory_space<vmem>>, vector<16x64xbf16>
    tpu.vector_store %arg8[%c0_18, %c0_19], %46 {strides = array<i32>} : memref<16x64xbf16, #tpu.memory_space<vmem>>, vector<16x64xbf16>,
    %48 = arith.truncf %19 : vector<16x64xf32> to vector<16x64xbf16>
    %c0_20 = arith.constant 0 : index
    %c0_21 = arith.constant 0 : index
    %49 = vector.load %arg9[%c0_20, %c0_21] : memref<16x64xbf16, #tpu.memory_space<vmem>>, vector<16x64xbf16>
    tpu.vector_store %arg9[%c0_20, %c0_21], %48 {strides = array<i32>} : memref<16x64xbf16, #tpu.memory_space<vmem>>, vector<16x64xbf16>,
    return
  }
  func.func @transform_0(%arg0: i32) -> (i32, i32) {
    %c0_i32 = arith.constant 0 : i32
    %c0_i32_0 = arith.constant 0 : i32
    return %arg0, %c0_i32 : i32, i32
  }
  func.func @transform_1(%arg0: i32) -> (i32, i32) {
    %c0_i32 = arith.constant 0 : i32
    %c0_i32_0 = arith.constant 0 : i32
    %c0_i32_1 = arith.constant 0 : i32
    return %c0_i32, %c0_i32_0 : i32, i32
  }
  func.func @transform_2(%arg0: i32) -> (i32, i32) {
    %c0_i32 = arith.constant 0 : i32
    %c0_i32_0 = arith.constant 0 : i32
    %c0_i32_1 = arith.constant 0 : i32
    return %c0_i32, %c0_i32_0 : i32, i32
  }
  func.func @transform_3(%arg0: i32) -> (i32, i32) {
    %c0_i32 = arith.constant 0 : i32
    %c0_i32_0 = arith.constant 0 : i32
    %c0_i32_1 = arith.constant 0 : i32
    return %c0_i32, %c0_i32_0 : i32, i32
  }
  func.func @transform_4(%arg0: i32) -> (i32, i32) {
    %c1_i32 = arith.constant 1 : i32
    %c0_i32 = arith.constant 0 : i32
    %0 = arith.cmpi eq, %c1_i32, %c0_i32 : i32
    %c1_i32_0 = arith.constant 1 : i32
    %1 = arith.select %0, %c1_i32_0, %c1_i32 : i32
    %2 = arith.remsi %arg0, %1 : i32
    %c0_i32_1 = arith.constant 0 : i32
    %3 = arith.cmpi ne, %2, %c0_i32_1 : i32
    %c0_i32_2 = arith.constant 0 : i32
    %4 = arith.cmpi slt, %2, %c0_i32_2 : i32
    %c0_i32_3 = arith.constant 0 : i32
    %5 = arith.cmpi slt, %1, %c0_i32_3 : i32
    %6 = arith.xori %4, %5 : i1
    %7 = arith.andi %6, %3 : i1
    %8 = arith.addi %2, %1 : i32
    %9 = arith.select %7, %8, %2 : i32
    %c0_i32_4 = arith.constant 0 : i32
    %c0_i32_5 = arith.constant 0 : i32
    return %9, %c0_i32_4 : i32, i32
  }
  func.func @transform_5(%arg0: i32) -> (i32, i32) {
    %c1_i32 = arith.constant 1 : i32
    %c0_i32 = arith.constant 0 : i32
    %0 = arith.cmpi eq, %c1_i32, %c0_i32 : i32
    %c1_i32_0 = arith.constant 1 : i32
    %1 = arith.select %0, %c1_i32_0, %c1_i32 : i32
    %2 = arith.remsi %arg0, %1 : i32
    %c0_i32_1 = arith.constant 0 : i32
    %3 = arith.cmpi ne, %2, %c0_i32_1 : i32
    %c0_i32_2 = arith.constant 0 : i32
    %4 = arith.cmpi slt, %2, %c0_i32_2 : i32
    %c0_i32_3 = arith.constant 0 : i32
    %5 = arith.cmpi slt, %1, %c0_i32_3 : i32
    %6 = arith.xori %4, %5 : i1
    %7 = arith.andi %6, %3 : i1
    %8 = arith.addi %2, %1 : i32
    %9 = arith.select %7, %8, %2 : i32
    %c0_i32_4 = arith.constant 0 : i32
    %c0_i32_5 = arith.constant 0 : i32
    return %9, %c0_i32_4 : i32, i32
  }
  func.func @transform_6(%arg0: i32) -> (i32, i32) {
    %c0_i32 = arith.constant 0 : i32
    %c0_i32_0 = arith.constant 0 : i32
    return %arg0, %c0_i32 : i32, i32
  }
  func.func @transform_7(%arg0: i32) -> (i32, i32) {
    %c0_i32 = arith.constant 0 : i32
    %c0_i32_0 = arith.constant 0 : i32
    return %arg0, %c0_i32 : i32, i32
  }
  func.func @transform_8(%arg0: i32) -> (i32, i32) {
    %c0_i32 = arith.constant 0 : i32
    %c0_i32_0 = arith.constant 0 : i32
    return %arg0, %c0_i32 : i32, i32
  }
}

</mosaic_0001>

<bundles_post_ra>
// kernel: tpu_custom_call.1
= control target key start
LH: loop header
LB: loop body
LE: loop exit
PB: predicated region body
PF: predicated region fallthrough
CT: control target
= control target key end

     0   :  { %s2108_s0 = inlined_call_operand.hbm [shape: f32[32,64], index: 0, kind: input, shape index: {}]   ;;  %s2109_s1 = inlined_call_operand.hbm [shape: bf16[64,64], index: 1, kind: input, shape index: {}]   ;;  %s2110_s2 = inlined_call_operand.hbm [shape: bf16[64,64], index: 2, kind: input, shape index: {}]   ;;  %s2111_s3 = inlined_call_operand.hbm [shape: bf16[64,64], index: 3, kind: input, shape index: {}]   ;;  %s2112_s4 = inlined_call_operand.hbm [shape: f32[16,64], index: 4, kind: input, shape index: {}]   ;;  %s2113_s5 = inlined_call_operand.hbm [shape: f32[16,64], index: 5, kind: input, shape index: {}]   ;;  %s2114_s6 = inlined_call_operand.hbm [shape: bf16[32,64], index: 6, kind: output, shape index: {0}]   ;;  %s2115_s7 = inlined_call_operand.hbm [shape: bf16[32,64], index: 7, kind: output, shape index: {1}]   ;;  %s2116_s8 = inlined_call_operand.hbm [shape: bf16[32,64], index: 8, kind: output, shape index: {2}]  }
   0x1   :  { %2123 = sst [smem:[#allocation23_spill]] %s2108_s0 }
   0x2   :  { %2124 = sst [smem:[#allocation24_spill]] %s2109_s1 }
   0x3   :  { %14 = vsyncpa [#allocation3], 0 }
   0x4   :  { %16 = vsyncpa [#allocation3 + $0x1], 0 }
   0x5   :  { %17 = vsyncpa [#allocation6], 0 }
   0x6   :  { %18 = vsyncpa [#allocation9], 0 }
   0x7   :  { %19 = vsyncpa [#allocation12], 0 }
   0x8   :  { %20 = vsyncpa [#allocation4], 0 }
   0x9   :  { %22 = vsyncpa [#allocation4 + $0x1], 0 }
   0xa   :  { %23 = vsyncpa [#allocation15], 0 }
   0xb   :  { %25 = vsyncpa [#allocation15 + $0x1], 0  ;;  %s1632_s27 = smov 0   ;;  %s1634_s28 = smov 0  }
   0xc   :  { %s1636_s29 = smov 0   ;;  %s1638_s30 = smov 0  }
   0xd LB: > { %s1568_s9 = smov [#allocation5]   ;;  %s1653_s11 = sadd.s32 4294967295, %s1566_s30   ;;  %s1566_s30 = sphi %s1638_s30, %s2151_s30   ;;  %s1562_s29 = sphi %s1636_s29, %s2150_s29   ;;  %s1558_s28 = sphi %s1634_s28, %s2149_s28   ;;  %s1554_s27 = sphi %s1632_s27, %s2148_s27  }
   0xe   : > { %s257_s10 = sshll.u32 %s1568_s9, 4  ;;  %p1012_p0 = scmp.ge.s32.totalorder %s1566_s30, 1  ;;  %s1658_s10 = int_to_ptr.vmem [resolvable:$true] %s257_s10 }
   0xf   : > { %p2117_p1 = scmp.eq.s32.totalorder %s1653_s11, 0  ;;  %p245_p2 = scmp.lt.s32.totalorder %s1566_s30, 3 }
  0x10   : > { %s1569_s13 = smov [#allocation8]   ;;  %s1570_s16 = smov [#allocation7]  }
  0x11   : > { %p1660_p3 = pnand %p1012_p0, %p245_p2  ;;  %s283_s14 = sshll.u32 %s1569_s13, 4  ;;  %s1673_s14 = int_to_ptr.vmem [resolvable:$true] %s283_s14 }
  0x12   : > { %s270_s17 = sshll.u32 %s1570_s16, 4  ;;  %s2127_s1 = sld [smem:[#allocation24_spill]]  ;;  %s1675_s17 = int_to_ptr.vmem [resolvable:$true] %s270_s17 }
  0x13   : > { %s2125_s12 = scalar_select %p1660_p3, 1, 0 }
  0x14   : > { %p1153_p5 = pneg %p1660_p3 }
  0x16   : > { %p1669_p6 = pnand %p1153_p5, %p2117_p1 }
  0x18   : > { %s1258_s20 = scalar_lea.hbm %s2127_s1, 512  ;;  %p1685_p8 = pneg %p1669_p6 }
  0x19   : > { %p1259_p7 = scmp.ne.s32.totalorder %s2127_s1, %s1258_s20  ;;  %p1265_p11 = scmp.lt.u32.totalorder %s1258_s20, %s2127_s1 }
  0x1b   : > { %p1261_p9 = pnand %p1685_p8, %p1259_p7 }
  0x1d   : > { %p1262_p10 = pneg %p1261_p9 }
  0x1f   : > { %p1267_p12 = pnand %p1265_p11, %p1262_p10 }
  0x21   : > { %1270 = shalt.err (!%p1267_p12)
}
  0x22   : > { %s1271_s26 = scalar_lea.vmem %s1658_s10, 512  ;;  %p1279_p5 = scmp.lt.s32.totalorder %s1658_s10, %s1658_s10 }
  0x23   : > { %p1272_p13 = scmp.ne.s32.totalorder %s1658_s10, %s1271_s26  ;;  %p1280_p4 = scmp.lt.s32.totalorder %s1271_s26, %s1271_s26 }
  0x25   : > { %p1274_p0 = pnand %p1272_p13, %p1685_p8  ;;  %p1281_p7 = por %p1280_p4, %p1279_p5 }
  0x27   : > { %p1275_p2 = pneg %p1274_p0 }
  0x29   : > { %p1282_p9 = pnand %p1281_p7, %p1275_p2 }
  0x2b   : > { %1285 = shalt.err (!%p1282_p9)
}
  0x2c   : > { %s1571_s9 = smov 64   ;;  %s1572_s13 = smov 4  }
  0x2d   : > { %1156 = dma.hbm_to_vmem [thread:$0]  (!%p1669_p6), %s2127_s1, 512, %s1658_s10, [#allocation6], %s1571_s9, %s1571_s9, %s1572_s13  }
  0x2e   : > { %s1286_s21 = scalar_lea.hbm %s2111_s3, 512 }
  0x2f   : > { %p1287_p4 = scmp.ne.s32.totalorder %s2111_s3, %s1286_s21  ;;  %p1293_p12 = scmp.lt.u32.totalorder %s1286_s21, %s2111_s3 }
  0x31   : > { %p1289_p10 = pnand %p1287_p4, %p1685_p8 }
  0x33   : > { %p1290_p11 = pneg %p1289_p10 }
  0x35   : > { %p1295_p13 = pnand %p1293_p12, %p1290_p11 }
  0x37   : > { %1298 = shalt.err (!%p1295_p13)
}
  0x38   : > { %s1299_s10 = scalar_lea.vmem %s1673_s14, 512  ;;  %p1307_p7 = scmp.lt.s32.totalorder %s1673_s14, %s1673_s14 }
  0x39   : > { %p1300_p0 = scmp.ne.s32.totalorder %s1673_s14, %s1299_s10  ;;  %p1308_p9 = scmp.lt.s32.totalorder %s1299_s10, %s1299_s10 }
  0x3b   : > { %p1302_p2 = pnand %p1300_p0, %p1685_p8  ;;  %p1309_p4 = por %p1308_p9, %p1307_p7 }
  0x3d   : > { %p1303_p5 = pneg %p1302_p2 }
  0x3f   : > { %p1310_p10 = pnand %p1309_p4, %p1303_p5 }
  0x41   : > { %1313 = shalt.err (!%p1310_p10)
}
  0x42   : > { %1162 = dma.hbm_to_vmem [thread:$0]  (!%p1669_p6), %s2111_s3, 512, %s1673_s14, [#allocation9], %s1571_s9, %s1571_s9, %s1572_s13  }
  0x43   : > { %s1314_s21 = scalar_lea.hbm %s2110_s2, 512 }
  0x44   : > { %p1315_p11 = scmp.ne.s32.totalorder %s2110_s2, %s1314_s21  ;;  %p1321_p0 = scmp.lt.u32.totalorder %s1314_s21, %s2110_s2 }
  0x46   : > { %p1317_p12 = pnand %p1315_p11, %p1685_p8 }
  0x48   : > { %p1318_p13 = pneg %p1317_p12 }
  0x4a   : > { %p1323_p2 = pnand %p1321_p0, %p1318_p13 }
  0x4c   : > { %1326 = shalt.err (!%p1323_p2)
}
  0x4d   : > { %s1327_s14 = scalar_lea.vmem %s1675_s17, 512  ;;  %p1335_p4 = scmp.lt.s32.totalorder %s1675_s17, %s1675_s17 }
  0x4e   : > { %p1328_p5 = scmp.ne.s32.totalorder %s1675_s17, %s1327_s14  ;;  %p1336_p10 = scmp.lt.s32.totalorder %s1327_s14, %s1327_s14 }
  0x50   : > { %p1330_p7 = pnand %p1328_p5, %p1685_p8  ;;  %p1337_p11 = por %p1336_p10, %p1335_p4 }
  0x52   : > { %p1331_p9 = pneg %p1330_p7 }
  0x54   : > { %p1338_p12 = pnand %p1337_p11, %p1331_p9 }
  0x56   : > { %1341 = shalt.err (!%p1338_p12)
}
  0x57   : > { %1159 = dma.hbm_to_vmem [thread:$0]  (!%p1669_p6), %s2110_s2, 512, %s1675_s17, [#allocation6], %s1571_s9, %s1571_s9, %s1572_s13  }
  0x58   : > { %s1573_s18 = smov [#allocation10]   ;;  %s1342_s22 = scalar_lea.hbm %s2112_s4, 256 }
  0x59   : > { %s296_s19 = sshll.u32 %s1573_s18, 4  ;;  %p1343_p13 = scmp.ne.s32.totalorder %s2112_s4, %s1342_s22  ;;  %s297_s19 = int_to_ptr.vmem [resolvable:$true] %s296_s19 }
  0x5a   : > { %p1349_p5 = scmp.lt.u32.totalorder %s1342_s22, %s2112_s4 }
  0x5b   : > { %p1345_p0 = pnand %p1343_p13, %p1685_p8 }
  0x5d   : > { %p1346_p2 = pneg %p1345_p0 }
  0x5f   : > { %p1351_p7 = pnand %p1349_p5, %p1346_p2 }
  0x61   : > { %1354 = shalt.err (!%p1351_p7)
}
  0x62   : > { %s1355_s17 = scalar_lea.vmem %s297_s19, 256  ;;  %p1363_p11 = scmp.lt.s32.totalorder %s297_s19, %s297_s19 }
  0x63   : > { %p1356_p9 = scmp.ne.s32.totalorder %s297_s19, %s1355_s17  ;;  %p1364_p12 = scmp.lt.s32.totalorder %s1355_s17, %s1355_s17 }
  0x65   : > { %p1358_p4 = pnand %p1356_p9, %p1685_p8  ;;  %p1365_p1 = por %p1364_p12, %p1363_p11 }
  0x67   : > { %p1359_p10 = pneg %p1358_p4 }
  0x69   : > { %p1366_p3 = pnand %p1365_p1, %p1359_p10 }
  0x6b   : > { %1369 = shalt.err (!%p1366_p3)
}
  0x6c   : > { %s2120_s9 = smov 128   ;;  %s2121_s13 = smov 8  }
  0x6d   : > { %1165 = dma.hbm_to_vmem [thread:$0]  (!%p1669_p6), %s2112_s4, 256, %s297_s19, [#allocation9], %s2120_s9, %s2120_s9, %s2121_s13  }
  0x6e   : > { %s1576_s18 = smov [#allocation11]   ;;  %s1370_s24 = scalar_lea.hbm %s2113_s5, 256 }
  0x6f   : > { %s309_s20 = sshll.u32 %s1576_s18, 4  ;;  %p1371_p1 = scmp.ne.s32.totalorder %s2113_s5, %s1370_s24  ;;  %s310_s20 = int_to_ptr.vmem [resolvable:$true] %s309_s20 }
  0x70   : > { %p1377_p0 = scmp.lt.u32.totalorder %s1370_s24, %s2113_s5 }
  0x71   : > { %p1373_p3 = pnand %p1371_p1, %p1685_p8 }
  0x73   : > { %p1374_p13 = pneg %p1373_p3 }
  0x75   : > { %p1379_p2 = pnand %p1377_p0, %p1374_p13 }
  0x77   : > { %1382 = shalt.err (!%p1379_p2)
}
  0x78   : > { %s1383_s19 = scalar_lea.vmem %s310_s20, 256  ;;  %p1391_p4 = scmp.lt.s32.totalorder %s310_s20, %s310_s20 }
  0x79   : > { %p1384_p5 = scmp.ne.s32.totalorder %s310_s20, %s1383_s19  ;;  %p1392_p10 = scmp.lt.s32.totalorder %s1383_s19, %s1383_s19 }
  0x7b   : > { %p1386_p7 = pnand %p1384_p5, %p1685_p8  ;;  %p1393_p11 = por %p1392_p10, %p1391_p4 }
  0x7d   : > { %p1387_p9 = pneg %p1386_p7 }
  0x7f   : > { %p1394_p12 = pnand %p1393_p11, %p1387_p9 }
  0x81   : > { %1397 = shalt.err (!%p1394_p12)
}
  0x82   : > { %1168 = dma.hbm_to_vmem [thread:$0]  (!%p1669_p6), %s2113_s5, 256, %s310_s20, [#allocation12], %s2120_s9, %s2120_s9, %s2121_s13  }
  0x83   : > { %s2119_s15 = sadd.s32 4294967294, %s1566_s30   ;;  %s1805_s23 = sadd.s32 1, %s1566_s30  }
  0x84   : > { %s38_s18 = sadd.s32 1, %s1562_s29  ;;  %s35_s21 = ssub.s32 %s1566_s30, %s1805_s23 }
  0x85   : > { %p45_p8 = scmp.ne.s32.totalorder %s1562_s29, %s1558_s28  ;;  %p36_p1 = scmp.eq.s32.totalorder %s35_s21, 0 }
  0x86   : > { %p46_p3 = scmp.eq.s32.totalorder %s1566_s30, 0  ;;  %p51_p13 = scmp.ne.s32.totalorder %s1558_s28, %s1554_s27 }
  0x87   : > { %p180_p0 = scmp.eq.s32.totalorder %s1653_s11, 1  ;;  %p2129_p5 = scmp.eq.s32.totalorder %s1653_s11, 0 }
  0x88   : > { %s1817_s22 = scalar_select %p36_p1, %s1562_s29, %s38_s18  }
  0x89   : > { %p47_p2 = por %p46_p3, %p45_p8  ;;  %p1821_p7 = por %p2129_p5, %p51_p13 }
  0x8a   : > { %p1825_p6 = por %p180_p0, %p45_p8  ;;  %p186_p9 = scmp.eq.s32.totalorder %s2119_s15, 1 }
  0x8b   : > { %p1188_p4 = scmp.lt.s32.totalorder %s1566_s30, 2  ;;  %s323_s25 = sand.u32 1, %s1562_s29  }
  0x8c   : > { %s2131_s20 = scalar_select %p1825_p6, 1, 0 }
  0x8d   : > { %p1833_p10 = por %p186_p9, %p51_p13  ;;  %s1019_s14 = sshll.u32 %s323_s25, 4 }
  0x8e   : > { %s1064_s17 = sshll.u32 %s1566_s30, 8  ;;  %s2133_s0 = sld [smem:[#allocation23_spill]] }
  0x8f   : > { %s2132_s26 = scalar_select %p1833_p10, 1, 0 }
  0x90   : > { %s327_s18 = scalar_lea.vmem [#allocation2], %s1019_s14  ;;  %p1843_p11 = pnand %p1188_p4, %p47_p2 }
  0x91   : > { %s334_s21 = sshll.u32 %s327_s18, 4  ;;  %s1849_s9 = scalar_lea.sflag [#allocation3], %s323_s25  ;;  %s1847_s21 = int_to_ptr.vmem [resolvable:$true] %s334_s21 }
  0x92   : > { %p1400_p8 = pneg %p1843_p11 }
  0x94   : > { %s1841_s16 = scalar_lea.hbm %s2133_s0, %s1064_s17  ;;  %s1403_s19 = scalar_lea.hbm %s2133_s0, 512 }
  0x95   : > { %s1398_s13 = scalar_lea.hbm %s1841_s16, 256  ;;  %p1404_p13 = scmp.lt.u32.totalorder %s1841_s16, %s2133_s0 }
  0x96   : > { %p1399_p12 = scmp.ne.s32.totalorder %s1841_s16, %s1398_s13  ;;  %p1405_p0 = scmp.lt.u32.totalorder %s1403_s19, %s1398_s13 }
  0x97   : > { %p1407_p5 = scmp.lt.u32.totalorder %s1398_s13, %s1841_s16 }
  0x98   : > { %p1401_p1 = pnand %p1400_p8, %p1399_p12  ;;  %p1406_p2 = por %p1405_p0, %p1404_p13 }
  0x9a   : > { %p1402_p3 = pneg %p1401_p1  ;;  %p1408_p9 = por %p1407_p5, %p1406_p2 }
  0x9c   : > { %p1409_p4 = pnand %p1408_p9, %p1402_p3 }
  0x9e   : > { %1412 = shalt.err (!%p1409_p4)
}
  0x9f   : > { %s1413_s25 = scalar_lea.vmem %s1847_s21, 256  ;;  %s1577_s14 = smov [#allocation2]  }
  0xa0   : > { %p1414_p12 = scmp.ne.s32.totalorder %s1847_s21, %s1413_s25  ;;  %s1418_s17 = sshll.u32 %s1577_s14, 4  ;;  %s1419_s17 = int_to_ptr.vmem [resolvable:$false] %s1418_s17 }
  0xa1   : > { %s1420_s10 = scalar_lea.vmem %s1419_s17, 512  ;;  %p1421_p6 = scmp.lt.s32.totalorder %s1847_s21, %s1419_s17 }
  0xa2   : > { %p1416_p1 = pnand %p1414_p12, %p1400_p8  ;;  %p1422_p13 = scmp.lt.s32.totalorder %s1420_s10, %s1413_s25 }
  0xa4   : > { %p1417_p10 = pneg %p1416_p1  ;;  %p1423_p0 = por %p1422_p13, %p1421_p6 }
  0xa6   : > { %p1424_p2 = pnand %p1423_p0, %p1417_p10 }
  0xa8   : > { %1427 = shalt.err (!%p1424_p2)
}
  0xa9   : > { %s2135_s13 = smov 8   ;;  %s2136_s19 = smov 128  }
  0xaa   : > { %1172 = dma.hbm_to_vmem [thread:$0]  (!%p1843_p11), %s1841_s16, 256, %s1847_s21, %s1849_s9, %s2136_s19, %s2136_s19, %s2135_s13  }
  0xab   : > { %p2137_p8 = scmp.ne.s32.totalorder %s2125_s12, 0 }
  0xac   : > { %s1883_s18 = sand.u32 (!%p2137_p8), 1, %s1558_s28  }
  0xad   : > { %346 = sbr.rel (%p2137_p8) target bundleno = 778 (0x30a), region = 44  ;;  %s1023_s25 = sshll.u32 (!%p2137_p8), %s1883_s18, 4 }
  0xae   : > { %s349_s14 = scalar_lea.sflag (!%p2137_p8), [#allocation3], %s1883_s18  ;;  %s352_s17 = scalar_lea.vmem (!%p2137_p8), [#allocation2], %s1023_s25 }
  0xb4   : > { %1529 = dma.done.wait (%p1821_p7), %s349_s14, 256  }
  0xb5   : > { %1531 = vsyncadd (%p1821_p7), %s349_s14, 4294967040  ;;  %p2138_p6 = scmp.eq.s32.totalorder %s1653_s11, 0 }
  0xb7   : > { %1533 = dma.done.wait (%p2138_p6), [#allocation6], 1024   ;;  %p2139_p10 = pmov %p2138_p6 }
  0xb8   : > { %p2140_p11 = pmov %p2138_p6 }
  0xb9   : > { %1535 = vsyncadd (%p2139_p10), [#allocation6], 4294966272 }
  0xba   : > { %1537 = dma.done.wait (%p2140_p11), [#allocation9], 768   ;;  %p2141_p3 = pmov %p2138_p6 }
  0xbc   : > { %1539 = vsyncadd (%p2141_p3), [#allocation9], 4294966528  ;;  %p2142_p5 = pmov %p2141_p3 }
  0xbd   : > { %p2143_p9 = pmov %p2141_p3 }
  0xbe   : > { %1541 = dma.done.wait (%p2142_p5), [#allocation12], 256  }
  0xbf   : > { %1543 = vsyncadd (%p2143_p9), [#allocation12], 4294967040  ;;  %v420_v0 = vld [vmem:[%s352_s17] sm:$0xff]  ;;  %vm424_vm0 = vcmask 523264   ;;  %v421_v1 = vld [vmem:[%s352_s17 + $0x8] sm:$0xff]  ;;  %v1578_v7 = vmov 0.0  }
  0xc0   : > { %v422_v2 = vmul.f32 %v420_v0, %v420_v0  ;;  %v423_v3 = vmul.f32 %v421_v1, %v421_v1  ;;  %v1242_v6 = vld [vmem:[#allocation5] sm:$0xff]   ;;  %1089 = vmatprep.subr.bf16.mxu0 %v1578_v7  ;;  %1101 = vmatprep.subr.bf16.mxu1 %v1578_v7  ;;  %v1244_v9 = vld [vmem:[#allocation5 + $0x8] sm:$0xff]   ;;  %vm1579_vm1 = vmmov 0   ;;  %v1246_v11 = vld [vmem:[#allocation5 + $0x10] sm:$0xff]   ;;  %s1580_s12 = smov 8   ;;  %s1581_s9 = smov 120  }
  0xc1   : > { %v1243_v8 = vld [vmem:[#allocation7] sm:$0xff]   ;;  %1090 = vmatpush3.bf16.msra.mxu0 %v1242_v6  ;;  %v1245_v10 = vld [vmem:[#allocation7 + $0x8] sm:$0xff]   ;;  %1097 = vmatprep.mubr.msk.bf16.mxu0 %vm1579_vm1, %v1578_v7  ;;  %v1247_v12 = vld [vmem:[#allocation7 + $0x10] sm:$0xff]   ;;  %s1921_s15 = sshll.u32 %s1883_s18, 3  ;;  %vm750_vm2 = vcmask 519168   ;;  %vm683_vm3 = vcmask 64512  }
  0xc2   : > { %v425_v4 = vsel %vm424_vm0, %v422_v2, 0.0  ;;  %v428_v5 = vsel %vm424_vm0, %v423_v3, 0.0  ;;  %1102 = vmatpush3.bf16.msra.mxu1 %v1243_v8  ;;  %1091 = vmatprep.subr.bf16.mxu0 %v1578_v7  ;;  %v1248_v13 = vld [vmem:[#allocation5 + $0x18] sm:$0xff]   ;;  %v1250_v25 = vld [vmem:[#allocation8] sm:$0xff]   ;;  %v1251_v27 = vld [vmem:[#allocation8 + $0x8] sm:$0xff]   ;;  %s1925_s24 = scalar_lea.vmem [#allocation16], %s1921_s15 }
  0xc3   : > { %426 = vadd.xlane.f32.xlu0 %v425_v4  ;;  %1103 = vmatprep.subr.bf16.mxu1 %v1578_v7  ;;  %v1249_v14 = vld [vmem:[#allocation7 + $0x18] sm:$0xff]   ;;  %v1252_v28 = vld [vmem:[#allocation8 + $0x10] sm:$0xff]   ;;  %vm686_vm4 = vcmask 130048   ;;  %vm689_vm5 = vcmask 195584   ;;  %vm692_vm6 = vcmask 261120   ;;  %vm695_vm7 = vcmask 326656  }
  0xc4   : > { %1109 = vmatprep.mubr.msk.bf16.mxu1 %vm1579_vm1, %v1578_v7  ;;  %v1253_v29 = vld [vmem:[#allocation8 + $0x18] sm:$0xff]   ;;  %vm698_vm8 = vcmask 392192   ;;  %vm701_vm9 = vcmask 457728   ;;  %v441_v51 = vld [vmem:[#allocation10] sm:$0xff]  ;;  %v443_v53 = vld [vmem:[#allocation11] sm:$0xff]  ;;  %s1947_s16 = scalar_lea.vmem [#allocation14], %s1921_s15 }
  0xc5   : > { %1092 = vmatpush3.bf16.msra.mxu0 %v1244_v9  ;;  %s1959_s21 = scalar_lea.vmem [#allocation13], %s1921_s15  ;;  %s778_s10 = sand.u32 1, %s1653_s11  }
  0xc6   : > { %1104 = vmatpush3.bf16.msra.mxu1 %v1245_v10  ;;  %1093 = vmatprep.subr.bf16.mxu0 %v1578_v7  ;;  %s1969_s13 = sshll.u32 %s1653_s11, 7  ;;  %s813_s19 = sshll.u32 %s1947_s16, 4  ;;  %s1982_s19 = int_to_ptr.vmem [resolvable:$true] %s813_s19 }
  0xc7   : > { %429 = vadd.xlane.f32.xlu0 %v428_v5  ;;  %1105 = vmatprep.subr.bf16.mxu1 %v1578_v7  ;;  %s829_s25 = sshll.u32 %s1925_s24, 4  ;;  %s1991_s15 = scalar_lea.hbm %s2116_s8, %s1969_s13  ;;  %s1984_s25 = int_to_ptr.vmem [resolvable:$true] %s829_s25 }
  0xc8   : > { %s1428_s14 = scalar_lea.vmem %s1982_s19, 128  ;;  %p2144_p4 = scmp.ne.s32.totalorder %s2131_s20, 0 }
  0xc9   : > { %1094 = vmatpush3.bf16.msra.mxu0 %v1246_v11  ;;  %p1429_p7 = scmp.ne.s32.totalorder %s1982_s19, %s1428_s14  ;;  %s1582_s17 = smov [#allocation14]  }
  0xca   : > { %1106 = vmatpush3.bf16.msra.mxu1 %v1247_v12  ;;  %1095 = vmatprep.subr.bf16.mxu0 %v1578_v7  ;;  %s1432_s0 = sshll.u32 %s1582_s17, 4  ;;  %s1433_s0 = int_to_ptr.vmem [resolvable:$false] %s1432_s0 }
  0xcb   : > { %1107 = vmatprep.subr.bf16.mxu1 %v1578_v7  ;;  %p1430_p12 = pnand %p1429_p7, %p2144_p4  ;;  %s1434_s1 = scalar_lea.vmem %s1433_s0, 256 }
  0xcc   : > { %p1435_p13 = scmp.lt.s32.totalorder %s1982_s19, %s1433_s0  ;;  %p1436_p0 = scmp.lt.s32.totalorder %s1434_s1, %s1428_s14 }
  0xcd   : > { %1096 = vmatpush3.bf16.msra.mxu0 %v1248_v13  ;;  %p1431_p1 = pneg %p1430_p12 }
  0xce   : > { %1108 = vmatpush3.bf16.msra.mxu1 %v1249_v14  ;;  %1113 = vmatprep.subr.bf16.mxu0 %v1578_v7  ;;  %p1437_p2 = por %p1436_p0, %p1435_p13 }
  0xd0   : > { %p1438_p8 = pnand %p1437_p2, %p1431_p1 }
 0x150   : > { %v427_v15 = vpop.xlane.xlu0 %426 }
 0x151   : > { %v432_v16 = vmul.f32 0.015625, %v427_v15  ;;  %v442_v15 = vld [vmem:[#allocation10 + $0x8] sm:$0xff] }
 0x153   : > { %v434_v17 = vadd.f32 1e-06, %v432_v16 }
 0x154   : > { %v430_v18 = vpop.xlane.xlu0 %429 }
 0x155   : > { %v433_v19 = vmul.f32 0.015625, %v430_v18  ;;  %1254 = vrsqrt.f32 %v434_v17  ;;  %v444_v17 = vld [vmem:[#allocation11 + $0x8] sm:$0xff] }
 0x157   : > { %v435_v20 = vadd.f32 1e-06, %v433_v19 }
 0x159   : > { %1256 = vrsqrt.f32 %v435_v20 }
 0x15f   : > { %v1255_v21 = vpop.eup %1254 }
 0x160   : > { %v438_v23 = vmul.f32 %v1255_v21, %v420_v0 }
 0x163   : > { %v1257_v22 = vpop.eup %1256 }
 0x164   : > { %v439_v24 = vmul.f32 %v1257_v22, %v421_v1 }
 0x166   : > { %v440_v26 = vpack.c.bf16 %v439_v24, %v438_v23 }
 0x168   : > { %1098 = vmatmul.mubr.msk.bf16.vlgmr.msra.gmra.mrb[0].mxu0 %vm424_vm0, %v440_v26  ;;  %1110 = vmatmul.mubr.msk.bf16.vlgmr.msra.gmra.mrb[0].mxu1 %vm424_vm0, %v440_v26 }
 0x169   : > { %1114 = vmatpush3.bf16.msra.mxu0 %v1250_v25  ;;  %1121 = vmatprep.mubr.msk.bf16.mxu0 %vm1579_vm1, %v1578_v7 }
 0x16a   : > { %1115 = vmatprep.subr.bf16.mxu0 %v1578_v7 }
 0x16d   : > { %1116 = vmatpush3.bf16.msra.mxu0 %v1251_v27 }
 0x16e   : > { %1117 = vmatprep.subr.bf16.mxu0 %v1578_v7 }
 0x171   : > { %1118 = vmatpush3.bf16.msra.mxu0 %v1252_v28 }
 0x172   : > { %1119 = vmatprep.subr.bf16.mxu0 %v1578_v7 }
 0x175   : > { %1120 = vmatpush3.bf16.msra.mxu0 %v1253_v29 }
 0x178   : > { %1122 = vmatmul.mubr.msk.bf16.vlgmr.msra.gmra.mrb[4].mxu0 %vm424_vm0, %v440_v26 }
 0x23b   : > { %v1911_v30 = vpop.f32.mrb[0].mxu0  ;;  %v587_v31 = vpop.f32.mrb[0].mxu1 }
 0x23c   : > { %718 = vrot.lane.b32.xlu0 %v587_v31, %s1580_s12  ;;  %712 = vrot.lane.b32.xlu1 %v587_v31, %s1581_s9  ;;  %v1099_v32 = vpop.f32.mrb[1].mxu0  ;;  %v1111_v33 = vpop.f32.mrb[1].mxu1  ;;  %v708_v56 = vmul.f32 %v587_v31, %v441_v51  ;;  %v667_v5 = vmul.f32 %v1911_v30, %v441_v51 }
 0x23d   : > { %v1913_v34 = vpop.f32.mrb[2].mxu0  ;;  %v1915_v35 = vpop.f32.mrb[2].mxu1 }
 0x23e   : > { %v1100_v36 = vpop.f32.mrb[3].mxu0  ;;  %v1112_v37 = vpop.f32.mrb[3].mxu1  ;;  %v709_v20 = vmul.f32 %v1915_v35, %v442_v15 }
 0x240   : > { %671 = vrot.lane.b32.xlu1 %v1911_v30, %s1581_s9 }
 0x244   : > { %677 = vrot.lane.b32.xlu1 %v1911_v30, %s1580_s12 }
 0x248   : > { %714 = vrot.lane.b32.xlu1 %v1915_v35, %s1581_s9 }
 0x24b   : > { %v660_v38 = vpop.f32.mrb[4].mxu0 }
 0x24c   : > { %v1069_v39 = vpack.c.bf16 %v660_v38, %v660_v38  ;;  %v1123_v40 = vpop.f32.mrb[5].mxu0  ;;  %720 = vrot.lane.b32.xlu1 %v1915_v35, %s1580_s12 }
 0x24d   : > { %v663_v41 = vpop.f32.mrb[6].mxu0 }
 0x24e   : > { %771 = vst.msk [vmem:[%s1925_s24] sm:$0xf] %vm750_vm2, %v1069_v39  ;;  %v1070_v42 = vpack.c.bf16 %v663_v41, %v663_v41  ;;  %v1124_v43 = vpop.f32.mrb[7].mxu0 }
 0x250   : > { %772 = vst.msk [vmem:[%s1925_s24 + $0x4] sm:$0xf] %vm750_vm2, %v1070_v42  ;;  %673 = vrot.lane.b32.xlu1 %v1913_v34, %s1581_s9  ;;  %s1997_s24 = scalar_lea.sflag [#allocation15], %s778_s10 }
 0x254   : > { %679 = vrot.lane.b32.xlu1 %v1913_v34, %s1580_s12  ;;  %s1980_s12 = scalar_lea.hbm %s2115_s7, %s1969_s13 }
 0x2ae   : > { %v719_v44 = vpop.permute.xlu0 %718  ;;  %v713_v45 = vpop.permute.xlu1 %712 }
 0x2af   : > { %v724_v46 = vsel %vm683_vm3, %v713_v45, %v719_v44 }
 0x2b0   : > { %v726_v47 = vsel %vm686_vm4, %v724_v46, %v713_v45 }
 0x2b1   : > { %v728_v48 = vsel %vm689_vm5, %v726_v47, %v719_v44 }
 0x2b2   : > { %v730_v49 = vsel %vm692_vm6, %v728_v48, %v713_v45  ;;  %v672_v50 = vpop.permute.xlu1 %671 }
 0x2b3   : > { %v732_v52 = vsel %vm695_vm7, %v730_v49, %v719_v44 }
 0x2b4   : > { %v734_v54 = vsel %vm698_vm8, %v732_v52, %v713_v45 }
 0x2b5   : > { %v736_v55 = vsel %vm701_vm9, %v734_v54, %v719_v44 }
 0x2b6   : > { %v738_v57 = vmul.f32 %v736_v55, %v443_v53  ;;  %v678_v58 = vpop.permute.xlu1 %677 }
 0x2b7   : > { %v684_v59 = vsel %vm683_vm3, %v672_v50, %v678_v58 }
 0x2b8   : > { %v740_v60 = vadd.f32 %v738_v57, %v708_v56  ;;  %v687_v61 = vsel %vm686_vm4, %v684_v59, %v672_v50 }
 0x2b9   : > { %v690_v62 = vsel %vm689_vm5, %v687_v61, %v678_v58 }
 0x2ba   : > { %v1067_v63 = vpack.c.bf16 %v740_v60, %v740_v60  ;;  %v693_v0 = vsel %vm692_vm6, %v690_v62, %v672_v50  ;;  %v715_v1 = vpop.permute.xlu1 %714 }
 0x2bb   : > { %v696_v2 = vsel %vm695_vm7, %v693_v0, %v678_v58 }
 0x2bc   : > { %v699_v3 = vsel %vm698_vm8, %v696_v2, %v672_v50  ;;  %761 = vst.msk [vmem:[%s1947_s16] sm:$0xf] %vm750_vm2, %v1067_v63 }
 0x2bd   : > { %v702_v4 = vsel %vm701_vm9, %v699_v3, %v678_v58 }
 0x2be   : > { %v704_v6 = vmul.f32 %v702_v4, %v443_v53  ;;  %v721_v7 = vpop.permute.xlu1 %720 }
 0x2bf   : > { %v725_v8 = vsel %vm683_vm3, %v715_v1, %v721_v7 }
 0x2c0   : > { %v706_v9 = vadd.f32 %v704_v6, %v667_v5  ;;  %v727_v10 = vsel %vm686_vm4, %v725_v8, %v715_v1 }
 0x2c1   : > { %v729_v11 = vsel %vm689_vm5, %v727_v10, %v721_v7 }
 0x2c2   : > { %v1065_v12 = vpack.c.bf16 %v706_v9, %v706_v9  ;;  %v731_v13 = vsel %vm692_vm6, %v729_v11, %v715_v1  ;;  %v674_v14 = vpop.permute.xlu1 %673 }
 0x2c3   : > { %v733_v16 = vsel %vm695_vm7, %v731_v13, %v721_v7 }
 0x2c4   : > { %751 = vst.msk [vmem:[%s1959_s21] sm:$0xf] %vm750_vm2, %v1065_v12  ;;  %v735_v18 = vsel %vm698_vm8, %v733_v16, %v715_v1 }
 0x2c5   : > { %v737_v19 = vsel %vm701_vm9, %v735_v18, %v721_v7 }
 0x2c6   : > { %v739_v21 = vmul.f32 %v737_v19, %v444_v17  ;;  %v680_v22 = vpop.permute.xlu1 %679 }
 0x2c7   : > { %v685_v23 = vsel %vm683_vm3, %v674_v14, %v680_v22 }
 0x2c8   : > { %v741_v24 = vadd.f32 %v739_v21, %v709_v20  ;;  %v688_v25 = vsel %vm686_vm4, %v685_v23, %v674_v14 }
 0x2c9   : > { %v691_v26 = vsel %vm689_vm5, %v688_v25, %v680_v22 }
 0x2ca   : > { %v1068_v27 = vpack.c.bf16 %v741_v24, %v741_v24  ;;  %v694_v28 = vsel %vm692_vm6, %v691_v26, %v674_v14 }
 0x2cb   : > { %v697_v29 = vsel %vm695_vm7, %v694_v28, %v680_v22 }
 0x2cc   : > { %v700_v30 = vsel %vm698_vm8, %v697_v29, %v674_v14  ;;  %762 = vst.msk [vmem:[%s1947_s16 + $0x4] sm:$0xf] %vm750_vm2, %v1068_v27 }
 0x2cd   : > { %v703_v31 = vsel %vm701_vm9, %v700_v30, %v680_v22 }
 0x2ce   : > { %1441 = shalt.err (!%p1438_p8)
}
 0x2cf   : > { %s1442_s16 = scalar_lea.hbm %s1980_s12, 128  ;;  %s1446_s9 = scalar_lea.hbm %s2115_s7, 256 }
 0x2d0   : > { %p1443_p6 = scmp.ne.s32.totalorder %s1980_s12, %s1442_s16  ;;  %p1447_p3 = scmp.lt.u32.totalorder %s1980_s12, %s2115_s7 }
 0x2d1   : > { %p1448_p5 = scmp.lt.u32.totalorder %s1446_s9, %s1442_s16  ;;  %p1450_p7 = scmp.lt.u32.totalorder %s1442_s16, %s1980_s12 }
 0x2d2   : > { %p1444_p10 = pnand %p1443_p6, %p2144_p4 }
 0x2d3   : > { %p1449_p9 = por %p1448_p5, %p1447_p3 }
 0x2d4   : > { %p1445_p11 = pneg %p1444_p10 }
 0x2d5   : > { %p1451_p12 = por %p1450_p7, %p1449_p9 }
 0x2d7   : > { %p1452_p1 = pnand %p1451_p12, %p1445_p11 }
 0x2d9   : > { %1455 = shalt.err (!%p1452_p1)
}
 0x2da   : > { %s1583_s1 = smov 64   ;;  %s1584_s14 = smov 4   ;;  %v668_v32 = vmul.f32 %v1913_v34, %v442_v15  ;;  %v705_v33 = vmul.f32 %v703_v31, %v444_v17 }
 0x2db   : > { %1148 = dma.vmem_to_hbm [thread:$0]  (%p2144_p4), %s1982_s19, 128, %s1980_s12, %s1997_s24, %s1583_s1, %s1583_s1, %s1584_s14  }
 0x2dc   : > { %s1456_s16 = scalar_lea.vmem %s1984_s25, 128  ;;  %s1585_s10 = smov [#allocation16]  }
 0x2dd   : > { %p1457_p13 = scmp.ne.s32.totalorder %s1984_s25, %s1456_s16  ;;  %s1460_s11 = sshll.u32 %s1585_s10, 4  ;;  %s1461_s11 = int_to_ptr.vmem [resolvable:$false] %s1460_s11 }
 0x2de   : > { %s1462_s9 = scalar_lea.vmem %s1461_s11, 256  ;;  %p1463_p8 = scmp.lt.s32.totalorder %s1984_s25, %s1461_s11 }
 0x2df   : > { %p1458_p0 = pnand %p1457_p13, %p2144_p4  ;;  %p1464_p6 = scmp.lt.s32.totalorder %s1462_s9, %s1456_s16 }
 0x2e1   : > { %p1459_p2 = pneg %p1458_p0  ;;  %p1465_p10 = por %p1464_p6, %p1463_p8 }
 0x2e3   : > { %p1466_p11 = pnand %p1465_p10, %p1459_p2 }
 0x2e5   : > { %1469 = shalt.err (!%p1466_p11)
}
 0x2e6   : > { %s1470_s19 = scalar_lea.hbm %s1991_s15, 128  ;;  %s1474_s0 = scalar_lea.hbm %s2116_s8, 256 }
 0x2e7   : > { %p1471_p3 = scmp.ne.s32.totalorder %s1991_s15, %s1470_s19  ;;  %p1475_p7 = scmp.lt.u32.totalorder %s1991_s15, %s2116_s8 }
 0x2e8   : > { %p1476_p12 = scmp.lt.u32.totalorder %s1474_s0, %s1470_s19  ;;  %p1478_p13 = scmp.lt.u32.totalorder %s1470_s19, %s1991_s15 }
 0x2e9   : > { %p1472_p5 = pnand %p1471_p3, %p2144_p4 }
 0x2ea   : > { %p1477_p1 = por %p1476_p12, %p1475_p7 }
 0x2eb   : > { %p1473_p9 = pneg %p1472_p5 }
 0x2ec   : > { %p1479_p0 = por %p1478_p13, %p1477_p1 }
 0x2ee   : > { %p1480_p2 = pnand %p1479_p0, %p1473_p9 }
 0x2f0   : > { %1483 = shalt.err (!%p1480_p2)
}
 0x2f1   : > { %1149 = dma.vmem_to_hbm [thread:$0]  (%p2144_p4), %s1984_s25, 128, %s1991_s15, %s1997_s24, %s1583_s1, %s1583_s1, %s1584_s14   ;;  %v707_v34 = vadd.f32 %v705_v33, %v668_v32 }
 0x2f2   : > { %s797_s16 = sshll.u32 %s1959_s21, 4  ;;  %s2055_s12 = scalar_lea.hbm %s2114_s6, %s1969_s13  ;;  %s2057_s16 = int_to_ptr.vmem [resolvable:$true] %s797_s16 }
 0x2f3   : > { %v1066_v35 = vpack.c.bf16 %v707_v34, %v707_v34  ;;  %s774_s17 = scalar_lea.sflag [#allocation4], %s1883_s18  ;;  %s1484_s0 = scalar_lea.vmem %s2057_s16, 128 }
 0x2f4   : > { %p1485_p8 = scmp.ne.s32.totalorder %s2057_s16, %s1484_s0  ;;  %s1586_s25 = smov [#allocation13]  }
 0x2f5   : > { %752 = vst.msk [vmem:[%s1959_s21 + $0x4] sm:$0xf] %vm750_vm2, %v1066_v35  ;;  %s1488_s15 = sshll.u32 %s1586_s25, 4  ;;  %s1489_s15 = int_to_ptr.vmem [resolvable:$false] %s1488_s15 }
 0x2f6   : > { %p1486_p6 = pnand %p1485_p8, %p2144_p4  ;;  %s1490_s24 = scalar_lea.vmem %s1489_s15, 256 }
 0x2f7   : > { %p1491_p11 = scmp.lt.s32.totalorder %s2057_s16, %s1489_s15  ;;  %p1492_p3 = scmp.lt.s32.totalorder %s1490_s24, %s1484_s0 }
 0x2f8   : > { %p1487_p10 = pneg %p1486_p6 }
 0x2f9   : > { %p1493_p5 = por %p1492_p3, %p1491_p11 }
 0x2fb   : > { %p1494_p9 = pnand %p1493_p5, %p1487_p10 }
 0x2fd   : > { %1497 = shalt.err (!%p1494_p9)
}
 0x2fe   : > { %s1498_s21 = scalar_lea.hbm %s2055_s12, 128  ;;  %s1502_s11 = scalar_lea.hbm %s2114_s6, 256 }
 0x2ff   : > { %p1499_p7 = scmp.ne.s32.totalorder %s2055_s12, %s1498_s21  ;;  %p1503_p13 = scmp.lt.u32.totalorder %s2055_s12, %s2114_s6 }
 0x300   : > { %p1504_p0 = scmp.lt.u32.totalorder %s1502_s11, %s1498_s21  ;;  %p1506_p8 = scmp.lt.u32.totalorder %s1498_s21, %s2055_s12 }
 0x301   : > { %p1500_p12 = pnand %p1499_p7, %p2144_p4 }
 0x302   : > { %p1505_p2 = por %p1504_p0, %p1503_p13 }
 0x303   : > { %p1501_p1 = pneg %p1500_p12 }
 0x304   : > { %p1507_p6 = por %p1506_p8, %p1505_p2 }
 0x306   : > { %p1508_p10 = pnand %p1507_p6, %p1501_p1 }
 0x308   : > { %1511 = shalt.err (!%p1508_p10)
}
 0x309   : > { %1147 = dma.vmem_to_hbm [thread:$0]  (%p2144_p4), %s2057_s16, 128, %s2055_s12, %s774_s17, %s1583_s1, %s1583_s1, %s1584_s14  }
 0x30a PF: > { %s844_s0 = sand.u32 1, %s1554_s27   ;;  %p2145_p11 = scmp.ne.s32.totalorder %s2132_s26, 0 }
 0x30b   : > { %p2146_p3 = scmp.ge.s32.totalorder %s1566_s30, 2  ;;  %s845_s25 = scalar_lea.sflag [#allocation4], %s844_s0 }
 0x30d   : > { %p1174_p5 = pnand %p2146_p3, %p2145_p11 }
 0x30f   : > { %1545 = dma.done.wait (!%p1174_p5), %s845_s25, 128  }
 0x310   : > { %1547 = vsyncadd (!%p1174_p5), %s845_s25, 4294967168  ;;  %s2147_s20 = sadd.s32 4294967294, %s1566_s30  }
 0x311   : > { %s853_s15 = sand.u32 1, %s2147_s20  }
 0x312   : > { %s854_s24 = scalar_lea.sflag [#allocation15], %s853_s15 }
 0x313   : > { %1549 = dma.done.wait (!%p1174_p5), %s854_s24, 256  }
 0x314   : > { %1551 = vsyncadd (!%p1174_p5), %s854_s24, 4294967040  ;;  %p28_p4 = scmp.ge.s32.totalorder %s1805_s23, 4   ;;  %s2148_s27 = smov %s1558_s28 }
 0x315   : > { %s2149_s28 = smov %s1562_s29  ;;  %s2150_s29 = smov %s1817_s22 }
 0x316   : > { %s2151_s30 = smov %s1805_s23  ;;  %30 = sbr.rel (!%p28_p4) target bundleno = 13 (0xd), region = 141 }
 0x31d   :  { %868 = vsyncpa [#allocation3], 1 }
 0x31e   :  { %870 = vsyncpa [#allocation3 + $0x1], 1 }
 0x31f   :  { %871 = vsyncpa [#allocation6], 1 }
 0x320   :  { %872 = vsyncpa [#allocation9], 1 }
 0x321   :  { %873 = vsyncpa [#allocation12], 1 }
 0x322   :  { %874 = vsyncpa [#allocation4], 1 }
 0x323   :  { %876 = vsyncpa [#allocation4 + $0x1], 1 }
 0x324   :  { %877 = vsyncpa [#allocation15], 1 }
 0x325   :  { %879 = vsyncpa [#allocation15 + $0x1], 1 }

</bundles_post_ra>
